<compile_context>
chip_gen: v6e
topology: v6e:2x2x1
jax: 0.10.0
libtpu: 0.0.40
codegen_flags: <defaults>
</compile_context>

<pallas_src>
import functools
import math

import jax
import jax.numpy as jnp
from jax.experimental import pallas as pl
from jax.experimental.pallas import tpu as pltpu


def _round_up(x, m):
    return (x + m - 1) // m * m


@functools.lru_cache(maxsize=None)
def _pltpu_roll_sign():
    """Probe pltpu.roll's rotation direction once (+1 == jnp.roll semantics)."""
    def probe(x_ref, o_ref):
        o_ref[...] = pltpu.roll(x_ref[...], 1, axis=0)

    x = jnp.arange(8 * 128, dtype=jnp.float32).reshape(8, 128)
    y = pl.pallas_call(probe, out_shape=jax.ShapeDtypeStruct((8, 128), jnp.float32))(x)
    return 1 if bool(jnp.all(y == jnp.roll(x, 1, axis=0))) else -1


# ------------------------------ fused heads kernel ---------------------------------

def _retina_heads_kernel(x_ref, tw_ref, tb_ref, fw_ref, fb_ref,
                         reg_ref, cls_ref,
                         buf_in, buf_a, buf_b,
                         *, H, W, Wpad, S, C, coutp, roll_sign):
    """Fused RetinaNet regression + classification heads for one image.

    x_ref   : (1, H, Wpad, C)   bf16  width-padded NHWC input (cols >= W are zero)
    tw_ref  : (2, 4, 9, C, C)   bf16  trunk conv weights  [head, layer, tap, cin, cout]
    tb_ref  : (2, 4, 1, C)      f32   trunk conv biases
    fw_ref  : (2, 9, C, coutp)  bf16  final conv weights (cout zero-padded to coutp)
    fb_ref  : (2, 1, coutp)     f32   final conv biases
    reg_ref : (1, S, coutp)     f32   regression output over the flattened padded grid
    cls_ref : (1, S, coutp)     f32   classification output
    buf_*   : (S, C)            f32   VMEM activation buffers (flattened (H+2, Wpad) grid)
    """
    # Interior mask over the flattened padded grid: rows 1..H, cols 0..W-1 are valid.
    g = jax.lax.broadcasted_iota(jnp.int32, (S, 1), 0)
    row = g // Wpad
    col = g - row * Wpad
    mask = jnp.logical_and(jnp.logical_and(row >= 1, row <= H),
                           col < W).astype(jnp.float32)

    # Stage the input: zero top/bottom halo rows, image rows in between
    # (column halo is already zero because the wrapper width-padded the input).
    zero_row = jnp.zeros((Wpad, C), jnp.float32)
    buf_in[0:Wpad, :] = zero_row
    buf_in[S - Wpad:S, :] = zero_row
    buf_in[Wpad:S - Wpad, :] = x_ref[0].astype(jnp.float32).reshape(H * Wpad, C)

    def conv3x3(src_ref, get_w, bias, relu, cout):
        # 3x3 conv == 9 shifted (S, C) @ (C, cout) bf16 MXU matmuls, f32 accumulation.
        src = src_ref[...]                                       # (S, C) f32
        acc = jnp.zeros((S, cout), jnp.float32)
        for ky in range(3):
            for kx in range(3):
                off = (ky - 1) * Wpad + (kx - 1)
                shift = (roll_sign * (-off)) % S
                tap = src if shift == 0 else pltpu.roll(src, shift, axis=0)
                acc = acc + jnp.dot(tap.astype(jnp.bfloat16), get_w(ky * 3 + kx),
                                    preferred_element_type=jnp.float32)
        acc = acc + bias
        if relu:
            acc = jnp.maximum(acc, 0.0)
        return acc

    for head, out_ref in ((0, reg_ref), (1, cls_ref)):
        src = buf_in
        for layer in range(4):                                   # conv3x3 + ReLU x 4
            dst = buf_a if layer % 2 == 0 else buf_b
            y = conv3x3(src,
                        lambda t, h=head, l=layer: tw_ref[h, l, t],
                        tb_ref[head, layer], relu=True, cout=C)
            dst[...] = y * mask                                  # keep halo exactly zero
            src = dst
        y = conv3x3(src,                                         # final conv, no ReLU
                    lambda t, h=head: fw_ref[h, t],
                    fb_ref[head], relu=False, cout=coutp)
        out_ref[0] = y.astype(out_ref.dtype)                     # lane-dense (S, 128) store


def _fused_heads(x_pad, packed, *, H, W, Wpad, S, coutp, roll_sign):
    """One fused pallas_call per level: both heads, all 10 convs, VMEM-resident."""
    tw, tb, fw, fb = packed
    N = x_pad.shape[0]
    C = tw.shape[-1]
    kernel = functools.partial(_retina_heads_kernel, H=H, W=W, Wpad=Wpad, S=S,
                               C=C, coutp=coutp, roll_sign=roll_sign)
    flops = 2 * N * S * 9 * C * (8 * C + 2 * coutp)
    bytes_accessed = (x_pad.size * 2 + tw.size * 2 + fw.size * 2
                      + tb.size * 4 + fb.size * 4 + 2 * N * S * coutp * 4)
    # TODO(synk): for large pyramid levels (e.g. 128x128x256) add a spatial grid axis with
    # a halo so the (S, C) scratch fits v7x's 64 MiB VMEM; not needed at these test sizes.
    return pl.pallas_call(
        kernel,
        out_shape=(jax.ShapeDtypeStruct((N, S, coutp), jnp.float32),
                   jax.ShapeDtypeStruct((N, S, coutp), jnp.float32)),
        grid_spec=pltpu.PrefetchScalarGridSpec(
            num_scalar_prefetch=0,
            grid=(N,),
            in_specs=[
                pl.BlockSpec((1, H, Wpad, C), lambda n: (n, 0, 0, 0)),
                # Constant block index -> weights are DMA'd once and stay in VMEM
                # (Pallas still reserves its default double buffer; vmem_limit covers it).
                pl.BlockSpec(tw.shape, lambda n: (0, 0, 0, 0, 0)),
                pl.BlockSpec(tb.shape, lambda n: (0, 0, 0, 0)),
                pl.BlockSpec(fw.shape, lambda n: (0, 0, 0, 0)),
                pl.BlockSpec(fb.shape, lambda n: (0, 0, 0)),
            ],
            out_specs=[
                pl.BlockSpec((1, S, coutp), lambda n: (n, 0, 0)),
                pl.BlockSpec((1, S, coutp), lambda n: (n, 0, 0)),
            ],
            scratch_shapes=[pltpu.VMEM((S, C), jnp.float32)] * 3,
        ),
        compiler_params=pltpu.CompilerParams(
            dimension_semantics=("parallel",),
            vmem_limit_bytes=48 * 1024 * 1024),
        cost_estimate=pl.CostEstimate(flops=flops, transcendentals=0,
                                      bytes_accessed=bytes_accessed),
    )(x_pad, tw, tb, fw, fb)


# --------------------------------- parameters ---------------------------------------

def _init_layer_params(key, in_channels, out_channels, last_bias):
    """Layer(in, out): 5 conv3x3 (HWIO weights), ReLU between the first four.
    Matches RetinaNet._init_weights: weights ~ N(0, 0.01), biases 0 except the
    focal-loss prior bias on the last classification conv."""
    chans = [(in_channels, in_channels)] * 4 + [(in_channels, out_channels)]
    keys = jax.random.split(key, 5)
    params = []
    for i, (cin, cout) in enumerate(chans):
        w = 0.01 * jax.random.normal(keys[i], (3, 3, cin, cout), jnp.float32)
        b = jnp.full((cout,), last_bias if i == 4 else 0.0, jnp.float32)
        params.append((w, b))
    return params


def _pack_heads(reg_params, cls_params, coutp):
    """Stack both heads' weights into the kernel layout (bf16 weights, f32 biases)."""
    def trunk(params):
        tw = jnp.stack([w.reshape(9, w.shape[2], w.shape[3]) for w, _ in params[:4]])
        tb = jnp.stack([b.reshape(1, -1) for _, b in params[:4]])
        return tw, tb

    def final(params):
        w, b = params[4]
        cout = w.shape[3]
        fw = jnp.pad(w.reshape(9, w.shape[2], cout), ((0, 0), (0, 0), (0, coutp - cout)))
        fb = jnp.pad(b.reshape(1, cout), ((0, 0), (0, coutp - cout)))
        return fw, fb

    tw_r, tb_r = trunk(reg_params)
    fw_r, fb_r = final(reg_params)
    tw_c, tb_c = trunk(cls_params)
    fw_c, fb_c = final(cls_params)
    tw = jnp.stack([tw_r, tw_c]).astype(jnp.bfloat16)      # (2, 4, 9, C, C)
    tb = jnp.stack([tb_r, tb_c]).astype(jnp.float32)       # (2, 4, 1, C)
    fw = jnp.stack([fw_r, fw_c]).astype(jnp.bfloat16)      # (2, 9, C, coutp)
    fb = jnp.stack([fb_r, fb_c]).astype(jnp.float32)       # (2, 1, coutp)
    return tw, tb, fw, fb


def _reference_head(x_nchw, params):
    """Pure-JAX reference (lax.conv) mirroring the kernel's bf16 rounding points."""
    h = jnp.transpose(x_nchw, (0, 2, 3, 1)).astype(jnp.bfloat16).astype(jnp.float32)
    for i, (w, b) in enumerate(params):
        a = h.astype(jnp.bfloat16).astype(jnp.float32)
        wq = w.astype(jnp.bfloat16).astype(jnp.float32)
        h = jax.lax.conv_general_dilated(
            a, wq, window_strides=(1, 1), padding="SAME",
            dimension_numbers=("NHWC", "HWIO", "NHWC"),
            precision=jax.lax.Precision.HIGHEST) + b
        if i < 4:
            h = jnp.maximum(h, 0.0)
    return h


# --------------------------------- RetinaNet ----------------------------------------

class RetinaNetPallas:
    """Training-mode forward of RetinaNet: feature pyramid -> (bbox_delta, confidences)."""

    def __init__(self, key, num_classes, in_channels=256):
        self.num_classes = num_classes
        self.num_boxes = 6
        self.in_channels = in_channels
        p = 0.99
        prior_bias = math.log(p * (num_classes - 1) / (1 - p))
        k_reg, k_cls = jax.random.split(key)
        self.reg_params = _init_layer_params(k_reg, in_channels,
                                             self.num_boxes * 4, last_bias=0.0)
        self.cls_params = _init_layer_params(k_cls, in_channels,
                                             self.num_boxes * num_classes,
                                             last_bias=prior_bias)
        self.coutp = _round_up(max(self.num_boxes * 4,
                                   self.num_boxes * num_classes), 128)
        self.packed = _pack_heads(self.reg_params, self.cls_params, self.coutp)
        self.roll_sign = _pltpu_roll_sign()

    def _run_level(self, x_nchw):
        N, _, H, W = x_nchw.shape
        Wpad = _round_up(W + 2, 8)                 # halo column(s) + sublane alignment
        S = (H + 2) * Wpad
        # NCHW -> NHWC once per level, bf16, width-padded so kernel buffers are tiled.
        x = jnp.transpose(x_nchw, (0, 2, 3, 1)).astype(jnp.bfloat16)
        x = jnp.pad(x, ((0, 0), (0, 0), (0, Wpad - W), (0, 0)))
        reg_wide, cls_wide = _fused_heads(x, self.packed, H=H, W=W, Wpad=Wpad, S=S,
                                          coutp=self.coutp, roll_sign=self.roll_sign)

        def crop(wide, cout):                      # drop halo rows / cols / pad channels
            return wide.reshape(N, H + 2, Wpad, self.coutp)[:, 1:H + 1, :W, :cout]

        return (crop(reg_wide, self.num_boxes * 4),
                crop(cls_wide, self.num_boxes * self.num_classes))

    @staticmethod
    def _to_pytorch_view(nhwc, groups):
        # NHWC -> NCHW on the small head output, then PyTorch-identical .view(N, groups, -1).
        N = nhwc.shape[0]
        return jnp.transpose(nhwc, (0, 3, 1, 2)).reshape(N, groups, -1)

    def regress_boxes(self, features_nchw):
        locations, confidences = [], []
        for x in features_nchw:
            reg, cls = self._run_level(x)
            locations.append(self._to_pytorch_view(reg, 4))
            confidences.append(self._to_pytorch_view(cls, self.num_classes))
        return jnp.concatenate(locations, axis=2), jnp.concatenate(confidences, axis=2)

    def reference_regress_boxes(self, features_nchw):
        """Pure-JAX reference path for numerical validation."""
        locations, confidences = [], []
        for x in features_nchw:
            reg = _reference_head(x, self.reg_params)
            cls = _reference_head(x, self.cls_params)
            locations.append(self._to_pytorch_view(reg, 4))
            confidences.append(self._to_pytorch_view(cls, self.num_classes))
        return jnp.concatenate(locations, axis=2), jnp.concatenate(confidences, axis=2)

    def __call__(self, features_nchw):
        # forward() in training mode: feature_extractor(img) is an injected external
        # backbone; its feature pyramid is supplied directly.
        # TODO(synk): forward_test (AnchorEncoder.decode_output + batched_nms /
        # filter_predictions) is data-dependent filtering with no clean Pallas
        # equivalent and is not implemented.
        return self.regress_boxes(features_nchw)


# ------------------------------------- main ------------------------------------------

if __name__ == "__main__":
    key = jax.random.PRNGKey(0)
    k_params, k_f1, k_f2 = jax.random.split(key, 3)

    NUM_CLASSES = 9          # num_classes (incl. background)
    N, C = 2, 256            # heads require 256 input channels
    # Small synthetic feature pyramid (stand-in for the external backbone).
    features = [
        jax.random.normal(k_f1, (N, C, 8, 8), jnp.float32),
        jax.random.normal(k_f2, (N, C, 4, 4), jnp.float32),
    ]

    model = RetinaNetPallas(k_params, num_classes=NUM_CLASSES, in_channels=C)
    bbox_delta, confs = model(features)
    bbox_delta, confs = jax.block_until_ready((bbox_delta, confs))

    total_anchors = 6 * (8 * 8 + 4 * 4)
    assert bbox_delta.shape == (N, 4, total_anchors), bbox_delta.shape
    assert confs.shape == (N, NUM_CLASSES, total_anchors), confs.shape
    assert bool(jnp.all(jnp.isfinite(bbox_delta))) and bool(jnp.all(jnp.isfinite(confs)))

    # Numerical check against a pure-JAX lax.conv reference with matching bf16 rounding.
    ref_bbox, ref_confs = model.reference_regress_boxes(features)
    assert bool(jnp.allclose(bbox_delta, ref_bbox, rtol=1e-2, atol=1e-2))
    assert bool(jnp.allclose(confs, ref_confs, rtol=1e-2, atol=1e-2))

    print("KERNEL_OK")
</pallas_src>

<mosaic_0001>
module attributes {stable_mosaic.version = 11 : i64} {
  func.func @probe(%arg0: memref<8x128xf32, #tpu.memory_space<vmem>>, %arg1: memref<8x128xf32, #tpu.memory_space<vmem>>) attributes {dimension_semantics = [], scalar_prefetch = 0 : i64, scratch_operands = 0 : i64, tpu.core_type = #tpu.core_type<tc>} {
    %c0 = arith.constant 0 : index
    %c0_0 = arith.constant 0 : index
    %0 = vector.load %arg0[%c0, %c0_0] : memref<8x128xf32, #tpu.memory_space<vmem>>, vector<8x128xf32>
    %c1_i32 = arith.constant 1 : i32
    %1 = tpu.dynamic_rotate %0 by %c1_i32 dim 0 : vector<8x128xf32>, i32 -> vector<8x128xf32>
    %c0_1 = arith.constant 0 : index
    %c0_2 = arith.constant 0 : index
    %2 = vector.load %arg1[%c0_1, %c0_2] : memref<8x128xf32, #tpu.memory_space<vmem>>, vector<8x128xf32>
    tpu.vector_store %arg1[%c0_1, %c0_2], %1 {strides = array<i32>} : memref<8x128xf32, #tpu.memory_space<vmem>>, vector<8x128xf32>,
    return
  }
}

</mosaic_0001>

<bundles_post_ra>
// kernel: tpu_custom_call.1
= control target key start
LH: loop header
LB: loop body
LE: loop exit
PB: predicated region body
PF: predicated region fallthrough
CT: control target
= control target key end

     0   :  { %6 = vsyncpa [#allocation3], 0  ;;  %s103_s0 = inlined_call_operand.hbm [shape: f32[8,128], index: 0, kind: input, shape index: {}]   ;;  %s104_s1 = inlined_call_operand.hbm [shape: f32[8,128], index: 1, kind: output, shape index: {}]  }
   0x1   :  { %7 = vsyncpa [#allocation4], 0  ;;  %s85_s6 = smov [#allocation2]  }
   0x2   :  { %s14_s7 = sshll.u32 %s85_s6, 4  ;;  %s15_s7 = int_to_ptr.vmem [resolvable:$true] %s14_s7 }
   0x3   :  { %s49_s8 = scalar_lea.vmem %s15_s7, 128  ;;  %p54_p1 = scmp.lt.s32.totalorder %s15_s7, %s15_s7 }
   0x4   :  { %p50_p0 = scmp.ne.s32.totalorder %s15_s7, %s49_s8  ;;  %p55_p2 = scmp.lt.s32.totalorder %s49_s8, %s49_s8 }
   0x6   :  { %p56_p3 = por %p55_p2, %p54_p1 }
   0x8   :  { %p57_p4 = pnand %p56_p3, %p50_p0 }
   0xa   :  { %60 = shalt.err (!%p57_p4)
}
   0xb   :  { %17 = dma.hbm_to_vmem [thread:$0]  %s103_s0, 128, %s15_s7, [#allocation3]  }
   0xc   :  { %81 = dma.done.wait [#allocation3], 128  }
   0xd   :  { %82 = vsyncadd [#allocation3], 4294967168  ;;  %s86_s11 = smov [#allocation5]   ;;  %v21_v0 = vld [vmem:[#allocation2] sm:$0xff] }
   0xe   :  { %s30_s12 = sshll.u32 %s86_s11, 4  ;;  %v22_v1 = vrot.slane %v21_v0, 7  ;;  %s31_s12 = int_to_ptr.vmem [resolvable:$true] %s30_s12 }
   0xf   :  { %s61_s13 = scalar_lea.vmem %s31_s12, 128  ;;  %p66_p6 = scmp.lt.s32.totalorder %s31_s12, %s31_s12 }
  0x10   :  { %23 = vst [vmem:[#allocation5] sm:$0xff] %v22_v1  ;;  %p62_p5 = scmp.ne.s32.totalorder %s31_s12, %s61_s13  ;;  %p67_p7 = scmp.lt.s32.totalorder %s61_s13, %s61_s13 }
  0x12   :  { %p68_p8 = por %p67_p7, %p66_p6 }
  0x14   :  { %p69_p9 = pnand %p68_p8, %p62_p5 }
  0x16   :  { %72 = shalt.err (!%p69_p9)
}
  0x17   :  { %33 = dma.vmem_to_hbm [thread:$0]  %s31_s12, 128, %s104_s1, [#allocation4]  }
  0x18   :  { %83 = dma.done.wait [#allocation4], 128  }
  0x19   :  { %84 = vsyncadd [#allocation4], 4294967168 }
  0x1a   :  { %37 = vsyncpa [#allocation3], 1 }
  0x1b   :  { %38 = vsyncpa [#allocation4], 1 }

</bundles_post_ra>
